<compile_context>
chip_gen: v6e
topology: v6e:2x2x1
jax: 0.10.0
libtpu: 0.0.40
codegen_flags: <defaults>
</compile_context>

<pallas_src>
import functools
import math

import jax
import jax.numpy as jnp
from jax.experimental import pallas as pl
from jax.experimental.pallas import tpu as pltpu

_NEG_LOG_1E4 = -math.log(1e-4)   # == -log(clip(onehot==0, 1e-4, 1.0))


def _round_up(x, m):
    return ((x + m - 1) // m) * m


def _choose_tile(n, max_tile):
    """Batch tile: big enough to amortize the ~0.35us/step overhead, capped at
    32K lanes for v7x's 64 MiB VMEM, aiming for an even >=2 tile count so both
    v7x TensorCores get balanced work."""
    if n <= 128:
        return n                                   # one full-extent block
    cap = max(128, (min(max_tile, 32768) // 128) * 128)
    nt = max(pl.cdiv(n, cap), 2)                   # at least 2 tiles
    if nt % 2:                                     # prefer an even tile count
        nt += 1
    return min(cap, _round_up(pl.cdiv(n, nt), 128))


def _sce_kernel(n_valid_ref, pred_ref, labels_ref, out_ref, *, alpha, beta):
    """One batch tile.

    n_valid_ref: (1,)       int32 in SMEM (prefetched scalar): valid batch size
    pred_ref:    (C, T)     logits in their storage dtype (bf16/f32)
    labels_ref:  (1, T)     class ids in a narrow int dtype
    out_ref:     (1, 128)   f32, the tile's partial sum broadcast over lanes
    """
    pred = pred_ref[...].astype(jnp.float32)        # cast AFTER the HBM load
    labels = labels_ref[...].astype(jnp.int32)      # widen narrow labels
    c, t = pred.shape

    # one-hot along the class (sublane) axis via iota compare (no gather)
    cls = jax.lax.broadcasted_iota(jnp.int32, (c, t), 0)
    onehot = (cls == labels).astype(jnp.float32)    # (C, T)

    # ---- numerically-stable cross entropy --------------------------------
    m = jnp.max(pred, axis=0, keepdims=True)                  # (1, T)
    e = jnp.exp(pred - m)                                     # only (C,T) exp
    sum_exp = jnp.sum(e, axis=0, keepdims=True)               # (1, T)
    lse = jnp.log(sum_exp) + m                                # (1, T)
    picked = jnp.sum(onehot * pred, axis=0, keepdims=True)    # logit at label
    ce = lse - picked                                         # (1, T)

    # ---- reverse cross entropy (collapsed) --------------------------------
    # softmax <= 1, so the upper clip is inert: use maximum() only.
    inv_sum = pl.reciprocal(sum_exp, approx=False)            # (1, T)
    p_sum = jnp.sum(jnp.maximum(e * inv_sum, 1e-7),
                    axis=0, keepdims=True)                    # (1, T)
    p_at_y = jnp.maximum(jnp.exp(picked - lse), 1e-7)         # (1, T)
    rce = _NEG_LOG_1E4 * (p_sum - p_at_y)                     # (1, T)

    # ---- mask ragged tail (undefined bytes in a partial last block) -------
    loss = alpha * ce + beta * rce                            # (1, T)
    col = jax.lax.broadcasted_iota(jnp.int32, (1, t), 1) + pl.program_id(0) * t
    loss = jnp.where(col < n_valid_ref[0], loss, 0.0)

    # one f32 partial sum per grid step, lane-broadcast into a (1,128) block
    tile_sum = jnp.sum(loss, axis=1, keepdims=True)           # (1, 1)
    out_ref[...] = jnp.broadcast_to(tile_sum, (1, 128)).astype(jnp.float32)


def sce_loss(pred, labels, *, alpha=0.1, beta=1.0, num_classes=10,
             max_tile=32768, class_major=False):
    """Pallas implementation of SCELoss.forward(pred, labels).

    pred: (N, C) logits (PyTorch module layout), or (C, N) if class_major=True.
          For peak performance produce class-major logits upstream (fuse the
          transpose into the final projection) and pass class_major=True; the
          (N, C) path performs a single HBM transpose here for compatibility.
    labels: (N,) integer class ids; narrow dtypes (int8/uint8) are DMA'd as-is
            and widened in-kernel.
    """
    if class_major:
        pred_cn = pred                       # already (C, N): no wrapper copy
    else:
        pred_cn = pred.T                     # one-off HBM transpose
    c, n = pred_cn.shape
    assert c == num_classes

    labels = labels.reshape(-1)
    if (not jnp.issubdtype(labels.dtype, jnp.integer)) or labels.dtype.itemsize > 4:
        labels = labels.astype(jnp.int32)
    labels_row = labels.reshape(1, n)

    tile = _choose_tile(n, max_tile)
    num_tiles = pl.cdiv(n, tile)
    n_valid = jnp.array([n], dtype=jnp.int32)    # prefetched SMEM scalar

    kernel = functools.partial(_sce_kernel, alpha=alpha, beta=beta)

    partials = pl.pallas_call(
        kernel,
        grid_spec=pltpu.PrefetchScalarGridSpec(
            num_scalar_prefetch=1,
            grid=(num_tiles,),
            in_specs=[
                pl.BlockSpec((c, tile), lambda i, n_ref: (0, i)),   # logits
                pl.BlockSpec((1, tile), lambda i, n_ref: (0, i)),   # labels
            ],
            out_specs=pl.BlockSpec((1, 128), lambda i, n_ref: (0, i)),
        ),
        out_shape=jax.ShapeDtypeStruct((1, 128 * num_tiles), jnp.float32),
        compiler_params=pltpu.CompilerParams(
            dimension_semantics=("parallel",),          # v7x: shard across TCs
            vmem_limit_bytes=48 * 1024 * 1024,          # headroom @ tile=32K,
        ),                                              # still < v7x physical
    )(n_valid, pred_cn, labels_row)

    per_tile = partials.reshape(num_tiles, 128)[:, 0]   # one scalar per tile
    return jnp.sum(per_tile) / jnp.float32(n)


def _sce_loss_ref(pred, labels, *, alpha=0.1, beta=1.0, num_classes=10):
    # pure-JAX reference mirroring the PyTorch module
    pred = pred.astype(jnp.float32)
    logp = jax.nn.log_softmax(pred, axis=1)
    onehot = jax.nn.one_hot(labels, num_classes, dtype=jnp.float32)
    ce = -jnp.mean(jnp.sum(onehot * logp, axis=1))
    p = jnp.clip(jax.nn.softmax(pred, axis=1), 1e-07, 1.0)
    rce = -jnp.sum(p * jnp.log(jnp.clip(onehot, 0.0001, 1.0)), axis=1)
    return alpha * ce + beta * jnp.mean(rce)


if __name__ == "__main__":
    key = jax.random.PRNGKey(0)
    k1, k2, k3, k4 = jax.random.split(key, 4)
    num_classes = 10

    # 1) tiny batch: single full-extent block, module (N, C) layout, int8 labels
    batch = 8
    pred = jax.random.normal(k1, (batch, num_classes), dtype=jnp.float32)
    labels = jax.random.randint(k2, (batch,), 0, num_classes,
                                dtype=jnp.int32).astype(jnp.int8)
    loss = jax.block_until_ready(sce_loss(pred, labels, alpha=0.1, beta=1.0,
                                          num_classes=num_classes))
    ref = _sce_loss_ref(pred, labels.astype(jnp.int32), alpha=0.1, beta=1.0,
                        num_classes=num_classes)
    assert jnp.allclose(loss, ref, rtol=1e-5, atol=1e-5), (loss, ref)

    # 2) multi-tile ragged batch (3 grid steps, last block partial), class-major
    #    fast path (no wrapper transpose), bf16 logits DMA'd in storage dtype
    batch2 = 300
    pred2 = jax.random.normal(k3, (batch2, num_classes),
                              dtype=jnp.float32).astype(jnp.bfloat16)
    labels2 = jax.random.randint(k4, (batch2,), 0, num_classes, dtype=jnp.int32)
    pred2_cn = pred2.T            # produced class-major upstream of the loss
    loss2 = jax.block_until_ready(
        sce_loss(pred2_cn, labels2, alpha=0.1, beta=1.0,
                 num_classes=num_classes, max_tile=128, class_major=True))
    ref2 = _sce_loss_ref(pred2, labels2, alpha=0.1, beta=1.0,
                         num_classes=num_classes)
    assert jnp.allclose(loss2, ref2, rtol=1e-4, atol=1e-4), (loss2, ref2)

    # 3) default tile selection on the (N, C) compatibility path: 2 even tiles
    #    of 256 with a ragged tail of 44
    pred3 = jax.random.normal(k3, (batch2, num_classes), dtype=jnp.float32)
    loss3 = jax.block_until_ready(
        sce_loss(pred3, labels2, alpha=0.1, beta=1.0, num_classes=num_classes))
    ref3 = _sce_loss_ref(pred3, labels2, alpha=0.1, beta=1.0,
                         num_classes=num_classes)
    assert jnp.allclose(loss3, ref3, rtol=1e-5, atol=1e-5), (loss3, ref3)

    print("KERNEL_OK")
</pallas_src>

<mosaic_0001>
module attributes {stable_mosaic.version = 11 : i64} {
  func.func @_sce_kernel(%arg0: i32, %arg1: memref<1xi32, #tpu.memory_space<smem>>, %arg2: memref<10x8xf32, #tpu.memory_space<vmem>>, %arg3: memref<1x8xi8, #tpu.memory_space<vmem>>, %arg4: memref<1x128xf32, #tpu.memory_space<vmem>>) attributes {dimension_semantics = [#tpu.dimension_semantics<parallel>], iteration_bounds = array<i64: 1>, scalar_prefetch = 1 : i64, scratch_operands = 0 : i64, tpu.core_type = #tpu.core_type<tc>, window_params = [{transform_indices = @transform_0, window_bounds = array<i64: 10, 8>}, {transform_indices = @transform_1, window_bounds = array<i64: 1, 8>}, {transform_indices = @transform_2, window_bounds = array<i64: 1, 128>}]} {
    %c0 = arith.constant 0 : index
    %c0_0 = arith.constant 0 : index
    %0 = vector.load %arg2[%c0, %c0_0] : memref<10x8xf32, #tpu.memory_space<vmem>>, vector<10x8xf32>
    %c0_1 = arith.constant 0 : index
    %c0_2 = arith.constant 0 : index
    %1 = vector.load %arg3[%c0_1, %c0_2] : memref<1x8xi8, #tpu.memory_space<vmem>>, vector<1x8xi8>
    %2 = arith.extsi %1 : vector<1x8xi8> to vector<1x8xi32>
    %3 = tpu.iota {dimensions = array<i32: 0>} : vector<10x8xi32>
    %4 = vector.broadcast %2 : vector<1x8xi32> to vector<10x8xi32>
    %5 = arith.cmpi eq, %3, %4 : vector<10x8xi32>
    %6 = arith.extui %5 : vector<10x8xi1> to vector<10x8xi32>
    %7 = arith.sitofp %6 : vector<10x8xi32> to vector<10x8xf32>
    %cst = arith.constant dense<0xFF800000> : vector<8xf32>
    %8 = vector.multi_reduction <maximumf>, %0, %cst [0] : vector<10x8xf32> to vector<8xf32>
    %9 = vector.shape_cast %8 : vector<8xf32> to vector<1x8xf32>
    %10 = vector.broadcast %9 : vector<1x8xf32> to vector<10x8xf32>
    %11 = arith.subf %0, %10 : vector<10x8xf32>
    %12 = math.exp %11 : vector<10x8xf32>
    %cst_3 = arith.constant dense<0.000000e+00> : vector<8xf32>
    %13 = vector.multi_reduction <add>, %12, %cst_3 [0] : vector<10x8xf32> to vector<8xf32>
    %14 = vector.shape_cast %13 : vector<8xf32> to vector<1x8xf32>
    %15 = math.log %14 : vector<1x8xf32>
    %16 = arith.addf %15, %9 : vector<1x8xf32>
    %17 = arith.mulf %7, %0 : vector<10x8xf32>
    %cst_4 = arith.constant dense<0.000000e+00> : vector<8xf32>
    %18 = vector.multi_reduction <add>, %17, %cst_4 [0] : vector<10x8xf32> to vector<8xf32>
    %19 = vector.shape_cast %18 : vector<8xf32> to vector<1x8xf32>
    %20 = arith.subf %16, %19 : vector<1x8xf32>
    %21 = tpu.reciprocal %14 : vector<1x8xf32> -> vector<1x8xf32>
    %22 = vector.broadcast %21 : vector<1x8xf32> to vector<10x8xf32>
    %23 = arith.mulf %12, %22 : vector<10x8xf32>
    %cst_5 = arith.constant 1.000000e-07 : f32
    %24 = vector.broadcast %cst_5 : f32 to vector<10x8xf32>
    %25 = arith.maximumf %23, %24 : vector<10x8xf32>
    %cst_6 = arith.constant dense<0.000000e+00> : vector<8xf32>
    %26 = vector.multi_reduction <add>, %25, %cst_6 [0] : vector<10x8xf32> to vector<8xf32>
    %27 = vector.shape_cast %26 : vector<8xf32> to vector<1x8xf32>
    %28 = arith.subf %19, %16 : vector<1x8xf32>
    %29 = math.exp %28 : vector<1x8xf32>
    %cst_7 = arith.constant 1.000000e-07 : f32
    %30 = vector.broadcast %cst_7 : f32 to vector<1x8xf32>
    %31 = arith.maximumf %29, %30 : vector<1x8xf32>
    %32 = arith.subf %27, %31 : vector<1x8xf32>
    %cst_8 = arith.constant 9.21034049 : f32
    %33 = vector.broadcast %cst_8 : f32 to vector<1x8xf32>
    %34 = arith.mulf %33, %32 : vector<1x8xf32>
    %cst_9 = arith.constant 1.000000e-01 : f32
    %35 = vector.broadcast %cst_9 : f32 to vector<1x8xf32>
    %36 = arith.mulf %35, %20 : vector<1x8xf32>
    %cst_10 = arith.constant 1.000000e+00 : f32
    %37 = vector.broadcast %cst_10 : f32 to vector<1x8xf32>
    %38 = arith.mulf %37, %34 : vector<1x8xf32>
    %39 = arith.addf %36, %38 : vector<1x8xf32>
    %40 = tpu.iota {dimensions = array<i32: 1>} : vector<1x8xi32>
    %c8_i32 = arith.constant 8 : i32
    %41 = arith.muli %arg0, %c8_i32 : i32
    %42 = vector.broadcast %41 : i32 to vector<1x8xi32>
    %43 = arith.addi %40, %42 : vector<1x8xi32>
    %c0_11 = arith.constant 0 : index
    %44 = memref.load %arg1[%c0_11] : memref<1xi32, #tpu.memory_space<smem>>
    %45 = vector.broadcast %44 : i32 to vector<1x8xi32>
    %46 = arith.cmpi slt, %43, %45 : vector<1x8xi32>
    %cst_12 = arith.constant 0.000000e+00 : f32
    %47 = vector.broadcast %cst_12 : f32 to vector<1x8xf32>
    %48 = arith.select %46, %39, %47 : vector<1x8xi1>, vector<1x8xf32>
    %cst_13 = arith.constant dense<0.000000e+00> : vector<1xf32>
    %49 = vector.multi_reduction <add>, %48, %cst_13 [1] : vector<1x8xf32> to vector<1xf32>
    %50 = vector.shape_cast %49 : vector<1xf32> to vector<1x1xf32>
    %51 = vector.shape_cast %50 : vector<1x1xf32> to vector<1x1xf32>
    %52 = vector.broadcast %51 : vector<1x1xf32> to vector<1x128xf32>
    %c0_14 = arith.constant 0 : index
    %c0_15 = arith.constant 0 : index
    %53 = vector.load %arg4[%c0_14, %c0_15] : memref<1x128xf32, #tpu.memory_space<vmem>>, vector<1x128xf32>
    tpu.vector_store %arg4[%c0_14, %c0_15], %52 {strides = array<i32>} : memref<1x128xf32, #tpu.memory_space<vmem>>, vector<1x128xf32>,
    return
  }
  func.func @transform_0(%arg0: i32, %arg1: memref<1xi32, #tpu.memory_space<smem>>) -> (i32, i32) {
    %c0_i32 = arith.constant 0 : i32
    %c0_i32_0 = arith.constant 0 : i32
    return %c0_i32, %arg0 : i32, i32
  }
  func.func @transform_1(%arg0: i32, %arg1: memref<1xi32, #tpu.memory_space<smem>>) -> (i32, i32) {
    %c0_i32 = arith.constant 0 : i32
    %c0_i32_0 = arith.constant 0 : i32
    return %c0_i32, %arg0 : i32, i32
  }
  func.func @transform_2(%arg0: i32, %arg1: memref<1xi32, #tpu.memory_space<smem>>) -> (i32, i32) {
    %c0_i32 = arith.constant 0 : i32
    %c0_i32_0 = arith.constant 0 : i32
    return %c0_i32, %arg0 : i32, i32
  }
}

</mosaic_0001>

<bundles_post_ra>
// kernel: tpu_custom_call.1
= control target key start
LH: loop header
LB: loop body
LE: loop exit
PB: predicated region body
PF: predicated region fallthrough
CT: control target
= control target key end

     0   :  { %vm31_vm0 = vcmask 64512   ;;  %vm33_vm1 = vcmask 58368   ;;  %s205_s0 = inlined_call_operand.<no memory space> [shape: s32[1], index: 0, kind: input, shape index: {}]   ;;  %s206_s1 = inlined_call_operand.vmem [shape: f32[10,8], index: 1, kind: input, shape index: {}]   ;;  %s207_s2 = inlined_call_operand.vmem [shape: s8[1,8], index: 2, kind: input, shape index: {}]   ;;  %s208_s3 = inlined_call_operand.hbm [shape: f32[1,128], index: 3, kind: output, shape index: {}]  }
   0x1   :  { %v14_v0 = vld [vmem:[%s206_s1] sm:$0xff]  ;;  %v15_v1 = vld [vmem:[%s206_s1 + $0x8] sm:$0x3] }
   0x2   :  { %9 = vsyncpa [#allocation5], 0  ;;  %v32_v2 = vsel %vm31_vm0, %v14_v0, -inf  ;;  %v34_v3 = vsel %vm33_vm1, %v15_v1, -inf  ;;  %v18_v9 = vlaneseq  ;;  %v16_v13 = vld [vmem:[%s207_s2] sm:$0x1] }
   0x3   :  { %v35_v4 = vmax.f32 %v32_v2, %v34_v3  ;;  %v17_v18 = vunpack.c.0.s8 %v16_v13  ;;  %v157_v22 = vmov 0.0   ;;  %s158_s18 = smov [#allocation4]  }
   0x4   :  { %v19_v12 = vshrl.u32 %v18_v9, 7  ;;  %s113_s19 = sshll.u32 %s158_s18, 4  ;;  %s114_s19 = int_to_ptr.vmem [resolvable:$true] %s113_s19 }
   0x5   :  { %v36_v5 = vrot.slane %v35_v4, 4  ;;  %s135_s20 = scalar_lea.vmem %s114_s19, 16  ;;  %s139_s21 = scalar_lea.vmem %s114_s19, 32 }
   0x6   :  { %v23_v19 = vsub.s32 0, %v19_v12  ;;  %v20_v20 = vadd.s32 8, %v19_v12  ;;  %p136_p0 = scmp.ne.s32.totalorder %s114_s19, %s135_s20  ;;  %p140_p1 = scmp.lt.s32.totalorder %s114_s19, %s114_s19 }
   0x7   :  { %v37_v6 = vmax.f32 %v35_v4, %v36_v5  ;;  %v95_v5 = vand.u32 127, %v18_v9  ;;  %p141_p2 = scmp.lt.s32.totalorder %s139_s21, %s135_s20 }
   0x8   :  { %v24_v21 = vrot.slane %v17_v18, %v23_v19 }
   0x9   :  { %v38_v7 = vrot.slane %v37_v6, 2  ;;  %p142_p3 = por %p141_p2, %p140_p1 }
   0xa   :  { %vm25_vm2 = vcmp.eq.s32.totalorder %v19_v12, %v24_v21  ;;  %vm26_vm3 = vcmp.eq.s32.totalorder %v20_v20, %v24_v21 }
   0xb   :  { %v39_v8 = vmax.f32 %v37_v6, %v38_v7  ;;  %v121_v23 = vsel %vm25_vm2, 1.0, %v157_v22  ;;  %v122_v24 = vsel %vm26_vm3, 1.0, %v157_v22  ;;  %p143_p4 = pnand %p142_p3, %p136_p0 }
   0xc   :  { %v60_v26 = vmul.f32 %v121_v23, %v14_v0  ;;  %v61_v27 = vmul.f32 %v122_v24, %v15_v1 }
   0xd   :  { %v40_v10 = vrot.slane %v39_v8, 1 }
   0xe   :  { %v62_v32 = vsel %vm31_vm0, %v60_v26, 0.0  ;;  %v63_v33 = vsel %vm33_vm1, %v61_v27, 0.0 }
   0xf   :  { %v41_v11 = vmax.f32 %v39_v8, %v40_v10  ;;  %v64_v36 = vadd.f32 %v63_v33, %v62_v32  ;;  %v100_v8 = vstv %s205_s0 }
  0x10   :  { %vm101_vm4 = vcmp.lt.s32.totalorder %v95_v5, %v100_v8 }
  0x11   :  { %v42_v14 = vsub.f32 %v14_v0, %v41_v11  ;;  %v43_v15 = vsub.f32 %v15_v1, %v41_v11  ;;  %v65_v39 = vrot.slane %v64_v36, 4 }
  0x13   :  { %v44_v16 = vmul.f32 1.442695, %v42_v14  ;;  %v46_v17 = vmul.f32 1.442695, %v43_v15  ;;  %v66_v42 = vadd.f32 %v65_v39, %v64_v36 }
  0x15   :  { %125 = vpow2.f32 %v44_v16  ;;  %v67_v43 = vrot.slane %v66_v42, 2 }
  0x16   :  { %127 = vpow2.f32 %v46_v17 }
  0x17   :  { %v68_v44 = vadd.f32 %v67_v43, %v66_v42 }
  0x19   :  { %v69_v45 = vrot.slane %v68_v44, 1 }
  0x1b   :  { %v70_v49 = vadd.f32 %v69_v45, %v68_v44 }
  0x22   :  { %v126_v25 = vpop.eup %125 }
  0x23   :  { %v128_v28 = vpop.eup %127  ;;  %v48_v29 = vsel %vm31_vm0, %v126_v25, 0.0 }
  0x24   :  { %v49_v30 = vsel %vm33_vm1, %v128_v28, 0.0 }
  0x25   :  { %v50_v31 = vadd.f32 %v49_v30, %v48_v29 }
  0x27   :  { %v51_v34 = vrot.slane %v50_v31, 4 }
  0x29   :  { %v52_v35 = vadd.f32 %v51_v34, %v50_v31 }
  0x2b   :  { %v53_v37 = vrot.slane %v52_v35, 2 }
  0x2d   :  { %v54_v38 = vadd.f32 %v53_v37, %v52_v35 }
  0x2f   :  { %v55_v40 = vrot.slane %v54_v38, 1 }
  0x31   :  { %v56_v41 = vadd.f32 %v55_v40, %v54_v38 }
  0x33   :  { %129 = vlog2.f32 %v56_v41 }
  0x34   :  { %131 = vrcp.f32 %v56_v41 }
  0x40   :  { %v130_v46 = vpop.eup %129 }
  0x41   :  { %v132_v47 = vpop.eup %131  ;;  %v58_v48 = vmul.f32 0.6931472, %v130_v46 }
  0x42   :  { %v73_v50 = vmul.f32 %v132_v47, %v126_v25  ;;  %v74_v51 = vmul.f32 %v132_v47, %v128_v28 }
  0x43   :  { %v59_v52 = vadd.f32 %v58_v48, %v41_v11 }
  0x44   :  { %v75_v53 = vmax.f32 %v73_v50, 1e-07  ;;  %v76_v54 = vmax.f32 %v74_v51, 1e-07 }
  0x45   :  { %v86_v55 = vsub.f32 %v70_v49, %v59_v52  ;;  %v71_v1 = vsub.f32 %v59_v52, %v70_v49 }
  0x46   :  { %v77_v56 = vsel %vm31_vm0, %v75_v53, 0.0  ;;  %v78_v57 = vsel %vm33_vm1, %v76_v54, 0.0 }
  0x47   :  { %v79_v58 = vadd.f32 %v78_v57, %v77_v56  ;;  %v87_v59 = vmul.f32 1.442695, %v86_v55  ;;  %v92_v7 = vmul.f32 0.1, %v71_v1 }
  0x49   :  { %v80_v60 = vrot.slane %v79_v58, 4  ;;  %133 = vpow2.f32 %v87_v59 }
  0x4b   :  { %v81_v61 = vadd.f32 %v80_v60, %v79_v58 }
  0x4d   :  { %v82_v62 = vrot.slane %v81_v61, 2 }
  0x4f   :  { %v83_v63 = vadd.f32 %v82_v62, %v81_v61 }
  0x51   :  { %v84_v0 = vrot.slane %v83_v63, 1 }
  0x53   :  { %v85_v2 = vadd.f32 %v84_v0, %v83_v63 }
  0x56   :  { %v134_v3 = vpop.eup %133 }
  0x57   :  { %v89_v4 = vmax.f32 %v134_v3, 1e-07 }
  0x59   :  { %v90_v6 = vsub.f32 %v85_v2, %v89_v4 }
  0x5b   :  { %v91_v10 = vmul.f32 9.2103405, %v90_v6 }
  0x5d   :  { %v93_v11 = vadd.f32 %v92_v7, %v91_v10 }
  0x5f   :  { %v102_v12 = vsel %vm101_vm4, %v93_v11, 0.0 }
  0x60   :  { %v103_v13 = vsel %vm31_vm0, %v102_v12, 0.0 }
  0x61   :  { %104 = vadd.xlane.f32.xlu0 %v103_v13 }
  0xea   :  { %v105_v14 = vpop.xlane.xlu0 %104 }
  0xeb   :  { %106 = vst [vmem:[#allocation4] sm:$0x1] %v105_v14 }
  0xec   :  { %146 = shalt.err (!%p143_p4)
}
  0xed   :  { %116 = dma.vmem_to_hbm [thread:$0]  %s114_s19, 16, %s208_s3, [#allocation5]  }
  0xee   :  { %155 = dma.done.wait [#allocation5], 16  }
  0xef   :  { %156 = vsyncadd [#allocation5], 4294967280 }
  0xf0   :  { %120 = vsyncpa [#allocation5], 1 }

</bundles_post_ra>
